<compile_context>
chip_gen: v7x
topology: tpu7x:2x2x1
jax: 0.10.0
libtpu: 0.0.40
codegen_flags: <defaults>
</compile_context>

<pallas_src>
import functools
import numpy as np
import jax
import jax.numpy as jnp
from jax import lax
from jax.experimental import pallas as pl
from jax.experimental.pallas import tpu as pltpu


# ---------------------------------------------------------------------------
# Pallas kernel
# ---------------------------------------------------------------------------
def _residual_gate_kernel(x_ref, wt_ref, b_ref, out_ref, *, lambda_r):
    # x: (TN, C), wt: (C, G) pre-transposed, b: (1, G)  ->  out: (TN, G + 1)
    x = x_ref[...]
    wt = wt_ref[...]
    b = b_ref[...]

    # MXU matmul with f32 accumulation: (TN, C) @ (C, G) -> (TN, G)
    s = lax.dot_general(x, wt, (((1,), (0,)), ((), ())),
                        preferred_element_type=jnp.float32)
    s = s + b.astype(jnp.float32)

    # Numerically-stable softmax along the (small) last dim.  The divide goes
    # to the EUP via an approximate reciprocal; lambda_r folds into the same
    # multiply.
    m = jnp.max(s, axis=-1, keepdims=True)
    e = jnp.exp(s - m)
    denom = jnp.sum(e, axis=-1, keepdims=True)
    scores = e * (pl.reciprocal(denom, approx=True) * lambda_r)

    # Fuse the leading ones-column in-kernel: single (TN, n_exp) store.
    ones = jnp.ones((scores.shape[0], 1), jnp.float32)
    out_ref[...] = jnp.concatenate([ones, scores], axis=-1).astype(out_ref.dtype)


# ---------------------------------------------------------------------------
# Tile selection / VMEM budgeting
# ---------------------------------------------------------------------------
_TARGET_X_TILE_BYTES = 2 << 20   # ~2 MiB per x buffer: >=85% HBM roofline per
                                 # measured tile sweeps; double-buffered it fits
                                 # comfortably on v5e (16 MiB scoped default),
                                 # v6e (32 MiB) and v7x (64 MiB physical).
_MIN_GRID_STEPS = 8              # keep the pipeline warm and give v7x's two
                                 # TensorCores something to shard.
_MAX_ROW_TILE = 4096


def _choose_row_tile(n, c, itemsize):
    if n <= 8:
        return n                                   # full-extent block: always legal
    tn = _TARGET_X_TILE_BYTES // max(1, c * itemsize)
    tn = max(8, min((int(tn) // 8) * 8, _MAX_ROW_TILE))
    # Keep >= _MIN_GRID_STEPS grid steps when N allows (never below 8 rows).
    cap_for_steps = max(8, ((n // _MIN_GRID_STEPS) // 8) * 8)
    tn = min(tn, cap_for_steps)
    # Never taller than the (rounded-up) array.
    tn = min(tn, ((n + 7) // 8) * 8)
    return tn


def _vmem_limit_bytes(tn, c, g, x_itemsize):
    n_exp = g + 1
    x_buf = 2 * tn * c * x_itemsize            # double-buffered x tile
    out_buf = 2 * tn * n_exp * 4               # double-buffered output tile
    w_res = 2 * (c * g * 4 + g * 4)            # resident weight^T + bias
    scratch = 4 * tn * max(g, 8) * 4           # f32 temporaries (logits/exp/sums)
    total = x_buf + out_buf + w_res + scratch + (4 << 20)   # headroom
    # Cap below v7x's 64 MiB physical VMEM; floor at the smallest useful limit.
    return int(min(48 << 20, max(total, 16 << 20)))


# ---------------------------------------------------------------------------
# Wrapper
# ---------------------------------------------------------------------------
def residual_gate_forward(x, w, b, lambda_r):
    """x: (..., C); w: (G, C) PyTorch nn.Linear layout; b: (G,). Returns (..., G+1) f32."""
    lead = x.shape[:-1]
    C = x.shape[-1]
    G = w.shape[0]
    n_exp = G + 1

    x2 = x.reshape(-1, C)                       # (N, C), native dtype (bf16 ok)
    N = x2.shape[0]
    TN = _choose_row_tile(N, C, x2.dtype.itemsize)
    grid = (pl.cdiv(N, TN),)                    # partial last block is masked

    w_t = w.T                                   # (C, G): one-time tiny transpose
    b2 = b.reshape(1, G)

    out = pl.pallas_call(
        functools.partial(_residual_gate_kernel, lambda_r=float(lambda_r)),
        out_shape=jax.ShapeDtypeStruct((N, n_exp), jnp.float32),
        grid_spec=pltpu.PrefetchScalarGridSpec(
            num_scalar_prefetch=0,
            grid=grid,
            in_specs=[
                pl.BlockSpec((TN, C), lambda i: (i, 0)),   # x row tile (pipelined)
                pl.BlockSpec((C, G), lambda i: (0, 0)),    # weight^T, VMEM-resident
                pl.BlockSpec((1, G), lambda i: (0, 0)),    # bias, resident
            ],
            out_specs=pl.BlockSpec((TN, n_exp), lambda i: (i, 0)),
        ),
        compiler_params=pltpu.CompilerParams(
            dimension_semantics=("parallel",),
            vmem_limit_bytes=_vmem_limit_bytes(TN, C, G, x2.dtype.itemsize)),
    )(x2, w_t, b2)

    return out.reshape(*lead, n_exp)


# ---------------------------------------------------------------------------
# Module wrapper (parameter setup in plain JAX)
# ---------------------------------------------------------------------------
def _torch_linear_init(key, d_out, d_in):
    # Matches PyTorch nn.Linear default init: bound = 1/sqrt(fan_in).
    kw, kb = jax.random.split(key)
    bound = 1.0 / np.sqrt(d_in)
    w = jax.random.uniform(kw, (d_out, d_in), jnp.float32, -bound, bound)
    b = jax.random.uniform(kb, (d_out,), jnp.float32, -bound, bound)
    return w, b


class ResidualGatePallas:
    def __init__(self, c_in, n_exp, lambda_r=1.0, *, key):
        assert n_exp >= 2, "need at least one gated expert (n_exp - 1 >= 1)"
        self.c_in = c_in
        self.n_exp = n_exp
        self.lambda_r = lambda_r
        self.w, self.b = _torch_linear_init(key, n_exp - 1, c_in)

    def __call__(self, x):
        return residual_gate_forward(x, self.w, self.b, self.lambda_r)


# ---------------------------------------------------------------------------
def _reference(x, w, b, lambda_r):
    s = jnp.einsum('...c,gc->...g', x.astype(jnp.float32), w) + b
    scores = jax.nn.softmax(s, axis=-1) * lambda_r
    ones = jnp.ones((*x.shape[:-1], 1), jnp.float32)
    return jnp.concatenate([ones, scores], axis=-1)


if __name__ == "__main__":
    key = jax.random.PRNGKey(0)
    k_x1, k_x2, k_x3, k_p1, k_p2 = jax.random.split(key, 5)

    B, S, C, n_exp = 2, 8, 32, 4

    # ---- 3-D f32 input (B, S, C), lambda_r = 1.0 ---------------------------
    x3 = jax.random.normal(k_x1, (B, S, C), jnp.float32)
    gate3 = ResidualGatePallas(C, n_exp, lambda_r=1.0, key=k_p1)
    out3 = jax.block_until_ready(gate3(x3))
    ref3 = _reference(x3, gate3.w, gate3.b, gate3.lambda_r)
    np.testing.assert_allclose(np.asarray(out3), np.asarray(ref3),
                               rtol=2e-3, atol=2e-3)
    assert out3.shape == (B, S, n_exp)
    assert np.allclose(np.asarray(out3[..., 0]), 1.0)

    # ---- 2-D f32 input (B, C), lambda_r = 0.7 ------------------------------
    x2 = jax.random.normal(k_x2, (B, C), jnp.float32)
    gate2 = ResidualGatePallas(C, n_exp, lambda_r=0.7, key=k_p2)
    out2 = jax.block_until_ready(gate2(x2))
    ref2 = _reference(x2, gate2.w, gate2.b, gate2.lambda_r)
    np.testing.assert_allclose(np.asarray(out2), np.asarray(ref2),
                               rtol=2e-3, atol=2e-3)
    assert out2.shape == (B, n_exp)

    # ---- bf16 input, row count NOT a multiple of the tile (cdiv path) ------
    x_bf = jax.random.normal(k_x3, (3, 5, C), jnp.float32)      # N = 15 rows
    out_bf = jax.block_until_ready(gate3(x_bf.astype(jnp.bfloat16)))
    ref_bf = _reference(x_bf, gate3.w, gate3.b, gate3.lambda_r)
    np.testing.assert_allclose(np.asarray(out_bf), np.asarray(ref_bf),
                               rtol=3e-2, atol=3e-2)
    assert out_bf.shape == (3, 5, n_exp)

    print("KERNEL_OK")
</pallas_src>

<mosaic_0001>
module attributes {stable_mosaic.version = 11 : i64} {
  func.func @_residual_gate_kernel(%arg0: i32, %arg1: memref<8x32xf32, #tpu.memory_space<vmem>>, %arg2: memref<32x3xf32, #tpu.memory_space<vmem>>, %arg3: memref<1x3xf32, #tpu.memory_space<vmem>>, %arg4: memref<8x4xf32, #tpu.memory_space<vmem>>) attributes {dimension_semantics = [#tpu.dimension_semantics<parallel>], iteration_bounds = array<i64: 2>, scalar_prefetch = 0 : i64, scratch_operands = 0 : i64, tpu.core_type = #tpu.core_type<tc>, window_params = [{transform_indices = @transform_0, window_bounds = array<i64: 8, 32>}, {pipeline_mode = #tpu.pipeline_mode<synchronous>, transform_indices = @transform_1, window_bounds = array<i64: 32, 3>}, {pipeline_mode = #tpu.pipeline_mode<synchronous>, transform_indices = @transform_2, window_bounds = array<i64: 1, 3>}, {transform_indices = @transform_3, window_bounds = array<i64: 8, 4>}]} {
    %c0 = arith.constant 0 : index
    %c0_0 = arith.constant 0 : index
    %0 = vector.load %arg1[%c0, %c0_0] : memref<8x32xf32, #tpu.memory_space<vmem>>, vector<8x32xf32>
    %c0_1 = arith.constant 0 : index
    %c0_2 = arith.constant 0 : index
    %1 = vector.load %arg2[%c0_1, %c0_2] : memref<32x3xf32, #tpu.memory_space<vmem>>, vector<32x3xf32>
    %c0_3 = arith.constant 0 : index
    %c0_4 = arith.constant 0 : index
    %2 = vector.load %arg3[%c0_3, %c0_4] : memref<1x3xf32, #tpu.memory_space<vmem>>, vector<1x3xf32>
    %cst = arith.constant dense<0.000000e+00> : vector<8x3xf32>
    %3 = tpu.matmul %0, %1, %cst {dimension_numbers = #tpu.dot_dimension_numbers<[1], [0], [0], [1], [0, 0, 1, 1], [], []>} : vector<8x32xf32>, vector<32x3xf32>, vector<8x3xf32> -> vector<8x3xf32>
    %4 = vector.broadcast %2 : vector<1x3xf32> to vector<8x3xf32>
    %5 = arith.addf %3, %4 : vector<8x3xf32>
    %cst_5 = arith.constant dense<0xFF800000> : vector<8xf32>
    %6 = vector.multi_reduction <maximumf>, %5, %cst_5 [1] : vector<8x3xf32> to vector<8xf32>
    %7 = vector.shape_cast %6 : vector<8xf32> to vector<8x1xf32>
    %8 = vector.broadcast %7 : vector<8x1xf32> to vector<8x3xf32>
    %9 = arith.subf %5, %8 : vector<8x3xf32>
    %10 = math.exp %9 : vector<8x3xf32>
    %cst_6 = arith.constant dense<0.000000e+00> : vector<8xf32>
    %11 = vector.multi_reduction <add>, %10, %cst_6 [1] : vector<8x3xf32> to vector<8xf32>
    %12 = vector.shape_cast %11 : vector<8xf32> to vector<8x1xf32>
    %13 = tpu.reciprocal %12 {approx = true} : vector<8x1xf32> -> vector<8x1xf32>
    %cst_7 = arith.constant 1.000000e+00 : f32
    %14 = vector.broadcast %cst_7 : f32 to vector<8x1xf32>
    %15 = arith.mulf %13, %14 : vector<8x1xf32>
    %16 = vector.broadcast %15 : vector<8x1xf32> to vector<8x3xf32>
    %17 = arith.mulf %10, %16 : vector<8x3xf32>
    %cst_8 = arith.constant 1.000000e+00 : f32
    %18 = vector.broadcast %cst_8 : f32 to vector<8x1xf32>
    %19 = tpu.concatenate %18, %17 in 1 : vector<8x1xf32>, vector<8x3xf32> -> vector<8x4xf32>
    %c0_9 = arith.constant 0 : index
    %c0_10 = arith.constant 0 : index
    %20 = vector.load %arg4[%c0_9, %c0_10] : memref<8x4xf32, #tpu.memory_space<vmem>>, vector<8x4xf32>
    tpu.vector_store %arg4[%c0_9, %c0_10], %19 {strides = array<i32>} : memref<8x4xf32, #tpu.memory_space<vmem>>, vector<8x4xf32>,
    return
  }
  func.func @transform_0(%arg0: i32) -> (i32, i32) {
    %c0_i32 = arith.constant 0 : i32
    %c0_i32_0 = arith.constant 0 : i32
    return %arg0, %c0_i32 : i32, i32
  }
  func.func @transform_1(%arg0: i32) -> (i32, i32) {
    %c0_i32 = arith.constant 0 : i32
    %c0_i32_0 = arith.constant 0 : i32
    %c0_i32_1 = arith.constant 0 : i32
    return %c0_i32, %c0_i32_0 : i32, i32
  }
  func.func @transform_2(%arg0: i32) -> (i32, i32) {
    %c0_i32 = arith.constant 0 : i32
    %c0_i32_0 = arith.constant 0 : i32
    %c0_i32_1 = arith.constant 0 : i32
    return %c0_i32, %c0_i32_0 : i32, i32
  }
  func.func @transform_3(%arg0: i32) -> (i32, i32) {
    %c0_i32 = arith.constant 0 : i32
    %c0_i32_0 = arith.constant 0 : i32
    return %arg0, %c0_i32 : i32, i32
  }
}

</mosaic_0001>

<bundles_post_ra>
// kernel: tpu_custom_call.1
= control target key start
LH: loop header
LB: loop body
LE: loop exit
PB: predicated region body
PF: predicated region fallthrough
CT: control target
= control target key end

     0   :  { %s406_s12 = smov 0   ;;  %s441_s0 = inlined_call_operand.vmem [shape: f32[16,32], index: 0, kind: input, shape index: {}]   ;;  %s442_s1 = inlined_call_operand.vmem [shape: f32[32,3], index: 1, kind: input, shape index: {}]   ;;  %s443_s2 = inlined_call_operand.vmem [shape: f32[1,3], index: 2, kind: input, shape index: {}]   ;;  %s444_s3 = inlined_call_operand.vmem [shape: f32[16,4], index: 3, kind: output, shape index: {}]  }
   0x1 LB: > { %s325_s13 = sadd.s32 4294967295, %s380_s12   ;;  %p329_p0 = scmp.ge.s32.totalorder %s380_s12, 1  ;;  %s380_s12 = sphi %s406_s12, %s13_s12  }
   0x2   : > { %p136_p1 = scmp.lt.s32.totalorder %s380_s12, 3 }
   0x4   : > { %p137_p2 = pnand %p329_p0, %p136_p1 }
   0x5   : > { %v167_v0 = vld [vmem:[%s442_s1] sm:$0xff] (!%p137_p2)  ;;  %v168_v1 = vld [vmem:[%s442_s1 + $0x8] sm:$0xff] (!%p137_p2)  ;;  %v169_v2 = vld [vmem:[%s442_s1 + $0x10] sm:$0xff] (!%p137_p2)  ;;  %v382_v3 = vmov (!%p137_p2), 0.0|0.0   ;;  %vm383_vm0 = vmmov (!%p137_p2), 0   ;;  %v384_v6 = vmov (!%p137_p2), 0.0  }
   0x6   : > { %140 = sbr.rel (%p137_p2) target bundleno = 662 (0x296), region = 32  ;;  %352 = vmatprep.subr.bf16.mxu0 (!%p137_p2), %v382_v3  ;;  %v353_v4 = vpack.c.bf16 (!%p137_p2), %v168_v1, %v167_v0  ;;  %v170_v5 = vld [vmem:[%s442_s1 + $0x18] sm:$0xff] (!%p137_p2)  ;;  %349 = vmatprep.mubr.msk.f32.mxu0 (!%p137_p2), %vm383_vm0, %v384_v6  ;;  %p158_p3 = scmp.lt.s32.totalorder (!%p137_p2), %s325_s13, 1  ;;  %vm178_vm1 = vcmask (!%p137_p2), 261120   ;;  %v332_v9 = vld [vmem:[%s443_s2] ss:$0 sm:$0xff] (!%p137_p2) }
   0x7   : > { %v356_v7 = vpack.c.bf16 (!%p137_p2), %v170_v5, %v169_v2  ;;  %vm252_vm2 = vcmask (!%p137_p2), 23552   ;;  %s385_s28 = smov (!%p137_p2), 1   ;;  %vm268_vm3 = vcmask (!%p137_p2), 7168   ;;  %vm270_vm4 = vcmask (!%p137_p2), 31744  }
   0x8   : > { %354 = vmatpush3.bf16.msra.mxu0 (!%p137_p2), %v353_v4 }
   0x9   : > { %355 = vmatprep.subr.bf16.mxu0 (!%p137_p2), %v382_v3 }
   0xc   : > { %357 = vmatpush3.bf16.msra.mxu0 (!%p137_p2), %v356_v7 }
   0xd   : > { %s446_s13 = smov (!%p158_p3, %s325_s13), 1 }
   0xe   : > { %s330_s22 = sshll.u32 %s446_s13, 3 }
   0xf   : > { %s161_s25 = scalar_lea.vmem %s441_s0, %s330_s22  ;;  %s165_s4 = scalar_lea.vmem %s444_s3, %s330_s22 }
  0x10   : > { %v166_v8 = vld [vmem:[%s161_s25] sm:$0xff] }
  0x11   : > { %350 = vmatmul.mubr.msk.f32.vlgmr.msra.gmra.mrb[0].mxu0 %vm178_vm1, %v166_v8 }
  0xe4   : > { %v248_v10 = vpop.f32.mrb[0].mxu0 }
  0xe5   : > { %v249_v11 = vadd.f32 %v332_v9, %v248_v10  ;;  %v351_v12 = vpop.f32.mrb[1].mxu0 }
  0xe7   : > { %v253_v13 = vsel %vm252_vm2, %v249_v11, -inf }
  0xe8   : > { %254 = vmax.xlane.f32.xlu0 %v253_v13 }
 0x175   : > { %v255_v14 = vpop.xlane.xlu0 %254 }
 0x176   : > { %v256_v15 = vsub.f32 %v249_v11, %v255_v14 }
 0x178   : > { %v257_v16 = vmul.f32 1.442695, %v256_v15 }
 0x17a   : > { %370 = vpow2.f32 %v257_v16 }
 0x184   : > { %v371_v17 = vpop.eup %370 }
 0x185   : > { %v259_v18 = vsel %vm252_vm2, %v371_v17, 0.0 }
 0x186   : > { %260 = vadd.xlane.f32.xlu0 %v259_v18 }
 0x213   : > { %v261_v19 = vpop.xlane.xlu0 %260 }
 0x214   : > { %372 = vrcp.f32 %v261_v19 }
 0x21e   : > { %v373_v20 = vpop.eup %372 }
 0x21f   : > { %v263_v21 = vmul.f32 %v373_v20, %v371_v17 }
 0x221   : > { %265 = vrot.lane.b32.xlu1 %v263_v21, %s385_s28 }
 0x293   : > { %v266_v22 = vpop.permute.xlu1 %265 }
 0x294   : > { %v269_v23 = vsel %vm268_vm3, 1.0, %v266_v22 }
 0x295   : > { %271 = vst.msk [vmem:[%s165_s4] sm:$0xff] %vm270_vm4, %v269_v23 }
 0x296 PF: > { %s13_s12 = sadd.s32 1, %s380_s12  }
 0x297   : > { %p10_p4 = scmp.ge.s32.totalorder %s13_s12, 4  }
 0x299   :  { %12 = sbr.rel (!%p10_p4) target bundleno = 1 (0x1), region = 62 }

</bundles_post_ra>
